<compile_context>
chip_gen: v7x
topology: tpu7x:2x2x1
jax: 0.10.0
libtpu: 0.0.40
codegen_flags: <defaults>
</compile_context>

<pallas_src>
import functools

import jax
import jax.numpy as jnp
from jax.experimental import pallas as pl
from jax.experimental.pallas import tpu as pltpu


def _loss_kernel(logits_o_ref, logits_n_ref, target_ref, out_ref, *,
                 pad_idx, mask_idx, weight_for_mask, n_total, tile_n):
    t, v = logits_o_ref.shape
    tgt = target_ref[...]                                   # (T, 1) int32

    # Valid rows of this (possibly ragged last) tile.
    row0 = pl.program_id(0) * tile_n
    row_id = row0 + jax.lax.broadcasted_iota(jnp.int32, (t, 1), 0)
    row_valid = row_id < n_total                            # (T, 1) bool

    # One shared one-hot mask (single compare, reused for both gathers).
    lane_idx = jax.lax.broadcasted_iota(jnp.int32, (t, v), 1)
    onehot = lane_idx == tgt                                # (T, V) bool

    def lse_f32(x):
        xf = x.astype(jnp.float32)
        m = jnp.max(xf, axis=-1, keepdims=True)
        return m + jnp.log(jnp.sum(jnp.exp(xf - m), axis=-1, keepdims=True))

    # ---- original logits: logsumexp (f32) + exact one-hot gather (native) --
    xo = logits_o_ref[...]                                  # native dtype
    lse_o = lse_f32(xo)                                     # (T, 1) f32
    zero_o = jnp.zeros((), dtype=xo.dtype)
    g_o = jnp.sum(jnp.where(onehot, xo, zero_o), axis=-1,
                  keepdims=True).astype(jnp.float32)        # exact (one nonzero)

    # ---- noised logits --------------------------------------------------
    xn = logits_n_ref[...]
    lse_n = lse_f32(xn)
    g_n = jnp.sum(jnp.where(onehot, xn, zero_o), axis=-1,
                  keepdims=True).astype(jnp.float32)

    # Per-token NLL weight: weight[target], with ignore_index zeroing it out.
    w = jnp.where(tgt == mask_idx, jnp.float32(weight_for_mask), jnp.float32(1.0))
    w = jnp.where(tgt == pad_idx, jnp.float32(0.0), w)      # (T, 1)

    # nll_o + nll_n = -sum_i w_i * ((xo_t + xn_t) - (lse_o + lse_n))
    nll_rows = -(w * ((g_o + g_n) - (lse_o + lse_n)))       # (T, 1) f32
    nll_part = jnp.sum(jnp.where(row_valid, nll_rows, 0.0))

    # ---- diversity: |lp_o - lp_n| = |(xo - xn) - (lse_o - lse_n)| ---------
    # Elementwise work stays in the input dtype (bf16 runs packed on v6e/v7x);
    # the reduction accumulates in f32.
    lse_delta = (lse_o - lse_n).astype(xo.dtype)            # (T, 1)
    adiff = jnp.abs((xo - xn) - lse_delta)                  # (T, V) native
    absdiff_rows = jnp.sum(adiff.astype(jnp.float32), axis=-1, keepdims=True)
    absdiff_part = jnp.sum(jnp.where(row_valid, absdiff_rows, 0.0))

    # Lane-dense partial output: lane 0 = nll partial, lane 1 = |diff| partial.
    lane = jax.lax.broadcasted_iota(jnp.int32, out_ref.shape, 2)
    out_ref[...] = jnp.where(lane == 0, nll_part,
                             jnp.where(lane == 1, absdiff_part, 0.0))


def _vmem_limit_bytes():
    """Per-generation scoped-VMEM limit: big tiles, but with headroom.

    v5e/v6e have 128 MiB physical VMEM -> use up to 96 MiB.
    v7x has only 64 MiB per TC -> stay ~20 MiB below physical."""
    cap = None
    try:
        cap = getattr(pltpu.get_tpu_info(), "vmem_capacity_bytes", None)
    except Exception:
        cap = None
    if not cap:
        cap = 64 << 20                      # conservative fallback (v7x-sized)
    limit = min(int(cap) - (20 << 20), 96 << 20)
    return max(limit, 16 << 20)


def _pick_tile_n(n, v, itemsize, vmem_limit):
    """Largest granularity-aligned row tile fitting the VMEM limit."""
    # Sublane-packing granularity of the streamed dtype.
    if itemsize >= 4:
        gran = 8
    elif itemsize == 2:
        gran = 16
    else:
        gran = 32
    if n <= gran:
        return n                                    # tiny N: one full block

    # Bytes resident in VMEM per logit row:
    #   2 logit inputs x 2 pipeline buffers (native dtype)
    # + ~2 native-dtype + ~4 f32 (T,V) temporaries live in the body
    # + (T,1) int32 target block padded to 128 lanes, double buffered.
    per_row = v * (4 * itemsize + 2 * itemsize + 4 * 4) + 2 * 128 * 4
    budget = int(vmem_limit * 0.85)                 # headroom for out/sems
    tile = max(1, budget // max(per_row, 1))
    tile = min(tile, n, 2048)

    if tile >= n:
        # Whole problem fits in one block; keep >= 2 grid steps when the split
        # stays granularity-aligned so v7x megacore can use both TensorCores.
        half = ((n // 2 + gran - 1) // gran) * gran
        if 0 < half < n:
            return half
        return n
    return max(gran, (tile // gran) * gran)         # ragged tail masked in-kernel


def pallas_loss(output_original, output_noised, target, *,
                pad_idx, mask_idx, weight_for_mask=2.0, lamb=1.0, alpha=0.5):
    """output_*: (..., V) logits; target: (...,) int.  Returns scalar f32 loss."""
    v = output_original.shape[-1]
    lo = output_original.reshape(-1, v)
    ln = output_noised.reshape(-1, v)
    n = lo.shape[0]
    tgt2d = target.reshape(n, 1).astype(jnp.int32)

    itemsize = jnp.dtype(lo.dtype).itemsize
    vmem_limit = _vmem_limit_bytes()
    tile_n = _pick_tile_n(n, v, itemsize, vmem_limit)
    num_tiles = pl.cdiv(n, tile_n)

    kernel = functools.partial(
        _loss_kernel,
        pad_idx=pad_idx, mask_idx=mask_idx,
        weight_for_mask=weight_for_mask, n_total=n, tile_n=tile_n)

    cost = pl.CostEstimate(
        flops=int(16 * n * v),
        transcendentals=int(2 * n * v),
        bytes_accessed=int(2 * n * v * itemsize + n * 4 + num_tiles * 8 * 128 * 4),
    )

    partials = pl.pallas_call(
        kernel,
        out_shape=jax.ShapeDtypeStruct((num_tiles, 8, 128), jnp.float32),
        grid_spec=pltpu.PrefetchScalarGridSpec(
            num_scalar_prefetch=0,
            grid=(num_tiles,),
            in_specs=[
                pl.BlockSpec((tile_n, v), lambda i: (i, 0)),
                pl.BlockSpec((tile_n, v), lambda i: (i, 0)),
                pl.BlockSpec((tile_n, 1), lambda i: (i, 0)),
            ],
            out_specs=pl.BlockSpec((1, 8, 128), lambda i: (i, 0, 0)),
        ),
        compiler_params=pltpu.CompilerParams(
            dimension_semantics=("parallel",),
            vmem_limit_bytes=int(vmem_limit)),
        cost_estimate=cost,
    )(lo, ln, tgt2d)

    # Finalize in the wrapper: independent per-tile partials -> scalar loss.
    nll = jnp.sum(partials[:, 0, 0])
    absdiff_sum = jnp.sum(partials[:, 0, 1])
    diversity = absdiff_sum / jnp.float32(n * v)
    return jnp.float32(lamb) * nll + jnp.float32(alpha) * diversity


def reference_loss(output_original, output_noised, target, *,
                   pad_idx, mask_idx, weight_for_mask=2.0, lamb=1.0, alpha=0.5):
    v = output_original.shape[-1]
    lpo = jax.nn.log_softmax(output_original.reshape(-1, v).astype(jnp.float32), axis=-1)
    lpn = jax.nn.log_softmax(output_noised.reshape(-1, v).astype(jnp.float32), axis=-1)
    t = target.reshape(-1)
    weight = jnp.ones((v,), jnp.float32).at[mask_idx].set(weight_for_mask)
    w = weight[t] * (t != pad_idx).astype(jnp.float32)
    nll = -jnp.sum(w * jnp.take_along_axis(lpo, t[:, None], axis=-1)[:, 0]) \
          - jnp.sum(w * jnp.take_along_axis(lpn, t[:, None], axis=-1)[:, 0])
    diversity = jnp.mean(jnp.abs(lpo - lpn))
    return lamb * nll + alpha * diversity


if __name__ == "__main__":
    B, S, V = 2, 8, 128
    PAD_IDX, MASK_IDX = 0, 1
    WEIGHT_FOR_MASK, LAMB, ALPHA = 2.0, 1.0, 0.5

    key = jax.random.PRNGKey(0)
    k1, k2, k3 = jax.random.split(key, 3)
    output_original = jax.random.normal(k1, (B, S, V), dtype=jnp.float32)
    output_noised = jax.random.normal(k2, (B, S, V), dtype=jnp.float32)
    target = jax.random.randint(k3, (B, S), 0, V, dtype=jnp.int32)
    # exercise ignore_index and the mask weight
    target = target.at[0, 0].set(PAD_IDX).at[1, 3].set(MASK_IDX)

    total = pallas_loss(output_original, output_noised, target,
                        pad_idx=PAD_IDX, mask_idx=MASK_IDX,
                        weight_for_mask=WEIGHT_FOR_MASK, lamb=LAMB, alpha=ALPHA)
    total = jax.block_until_ready(total)

    ref = reference_loss(output_original, output_noised, target,
                         pad_idx=PAD_IDX, mask_idx=MASK_IDX,
                         weight_for_mask=WEIGHT_FOR_MASK, lamb=LAMB, alpha=ALPHA)
    ref = jax.block_until_ready(ref)

    assert jnp.allclose(total, ref, rtol=1e-4, atol=1e-4), (total, ref)
    print("KERNEL_OK")
</pallas_src>

<mosaic_0001>
module attributes {stable_mosaic.version = 11 : i64} {
  func.func @_loss_kernel(%arg0: i32, %arg1: memref<8x128xf32, #tpu.memory_space<vmem>>, %arg2: memref<8x128xf32, #tpu.memory_space<vmem>>, %arg3: memref<8x1xi32, #tpu.memory_space<vmem>>, %arg4: memref<1x8x128xf32, #tpu.memory_space<vmem>>) attributes {dimension_semantics = [#tpu.dimension_semantics<parallel>], iteration_bounds = array<i64: 2>, scalar_prefetch = 0 : i64, scratch_operands = 0 : i64, tpu.core_type = #tpu.core_type<tc>, window_params = [{transform_indices = @transform_0, window_bounds = array<i64: 8, 128>}, {transform_indices = @transform_1, window_bounds = array<i64: 8, 128>}, {transform_indices = @transform_2, window_bounds = array<i64: 8, 1>}, {transform_indices = @transform_3, window_bounds = array<i64: 1, 8, 128>}]} {
    %c0 = arith.constant 0 : index
    %c0_0 = arith.constant 0 : index
    %0 = vector.load %arg3[%c0, %c0_0] : memref<8x1xi32, #tpu.memory_space<vmem>>, vector<8x1xi32>
    %c8_i32 = arith.constant 8 : i32
    %1 = arith.muli %arg0, %c8_i32 : i32
    %2 = tpu.iota {dimensions = array<i32: 0>} : vector<8x1xi32>
    %3 = vector.broadcast %1 : i32 to vector<8x1xi32>
    %4 = arith.addi %3, %2 : vector<8x1xi32>
    %c16_i32 = arith.constant 16 : i32
    %5 = vector.broadcast %c16_i32 : i32 to vector<8x1xi32>
    %6 = arith.cmpi slt, %4, %5 : vector<8x1xi32>
    %7 = tpu.iota {dimensions = array<i32: 1>} : vector<8x128xi32>
    %8 = vector.broadcast %0 : vector<8x1xi32> to vector<8x128xi32>
    %9 = arith.cmpi eq, %7, %8 : vector<8x128xi32>
    %c0_1 = arith.constant 0 : index
    %c0_2 = arith.constant 0 : index
    %10 = vector.load %arg1[%c0_1, %c0_2] : memref<8x128xf32, #tpu.memory_space<vmem>>, vector<8x128xf32>
    %cst = arith.constant dense<0xFF800000> : vector<8xf32>
    %11 = vector.multi_reduction <maximumf>, %10, %cst [1] : vector<8x128xf32> to vector<8xf32>
    %12 = vector.shape_cast %11 : vector<8xf32> to vector<8x1xf32>
    %13 = vector.broadcast %12 : vector<8x1xf32> to vector<8x128xf32>
    %14 = arith.subf %10, %13 : vector<8x128xf32>
    %15 = math.exp %14 : vector<8x128xf32>
    %cst_3 = arith.constant dense<0.000000e+00> : vector<8xf32>
    %16 = vector.multi_reduction <add>, %15, %cst_3 [1] : vector<8x128xf32> to vector<8xf32>
    %17 = vector.shape_cast %16 : vector<8xf32> to vector<8x1xf32>
    %18 = math.log %17 : vector<8x1xf32>
    %19 = arith.addf %12, %18 : vector<8x1xf32>
    %cst_4 = arith.constant 0.000000e+00 : f32
    %20 = vector.broadcast %cst_4 : f32 to vector<8x128xf32>
    %21 = arith.select %9, %10, %20 : vector<8x128xi1>, vector<8x128xf32>
    %cst_5 = arith.constant dense<0.000000e+00> : vector<8xf32>
    %22 = vector.multi_reduction <add>, %21, %cst_5 [1] : vector<8x128xf32> to vector<8xf32>
    %23 = vector.shape_cast %22 : vector<8xf32> to vector<8x1xf32>
    %c0_6 = arith.constant 0 : index
    %c0_7 = arith.constant 0 : index
    %24 = vector.load %arg2[%c0_6, %c0_7] : memref<8x128xf32, #tpu.memory_space<vmem>>, vector<8x128xf32>
    %cst_8 = arith.constant dense<0xFF800000> : vector<8xf32>
    %25 = vector.multi_reduction <maximumf>, %24, %cst_8 [1] : vector<8x128xf32> to vector<8xf32>
    %26 = vector.shape_cast %25 : vector<8xf32> to vector<8x1xf32>
    %27 = vector.broadcast %26 : vector<8x1xf32> to vector<8x128xf32>
    %28 = arith.subf %24, %27 : vector<8x128xf32>
    %29 = math.exp %28 : vector<8x128xf32>
    %cst_9 = arith.constant dense<0.000000e+00> : vector<8xf32>
    %30 = vector.multi_reduction <add>, %29, %cst_9 [1] : vector<8x128xf32> to vector<8xf32>
    %31 = vector.shape_cast %30 : vector<8xf32> to vector<8x1xf32>
    %32 = math.log %31 : vector<8x1xf32>
    %33 = arith.addf %26, %32 : vector<8x1xf32>
    %cst_10 = arith.constant 0.000000e+00 : f32
    %34 = vector.broadcast %cst_10 : f32 to vector<8x128xf32>
    %35 = arith.select %9, %24, %34 : vector<8x128xi1>, vector<8x128xf32>
    %cst_11 = arith.constant dense<0.000000e+00> : vector<8xf32>
    %36 = vector.multi_reduction <add>, %35, %cst_11 [1] : vector<8x128xf32> to vector<8xf32>
    %37 = vector.shape_cast %36 : vector<8xf32> to vector<8x1xf32>
    %c1_i32 = arith.constant 1 : i32
    %38 = vector.broadcast %c1_i32 : i32 to vector<8x1xi32>
    %39 = arith.cmpi eq, %0, %38 : vector<8x1xi32>
    %cst_12 = arith.constant 2.000000e+00 : f32
    %cst_13 = arith.constant 1.000000e+00 : f32
    %40 = vector.broadcast %cst_12 : f32 to vector<8x1xf32>
    %41 = vector.broadcast %cst_13 : f32 to vector<8x1xf32>
    %42 = arith.select %39, %40, %41 : vector<8x1xi1>, vector<8x1xf32>
    %c0_i32 = arith.constant 0 : i32
    %43 = vector.broadcast %c0_i32 : i32 to vector<8x1xi32>
    %44 = arith.cmpi eq, %0, %43 : vector<8x1xi32>
    %cst_14 = arith.constant 0.000000e+00 : f32
    %45 = vector.broadcast %cst_14 : f32 to vector<8x1xf32>
    %46 = arith.select %44, %45, %42 : vector<8x1xi1>, vector<8x1xf32>
    %47 = arith.addf %23, %37 : vector<8x1xf32>
    %48 = arith.addf %19, %33 : vector<8x1xf32>
    %49 = arith.subf %47, %48 : vector<8x1xf32>
    %50 = arith.mulf %46, %49 : vector<8x1xf32>
    %cst_15 = arith.constant 0.000000e+00 : f32
    %51 = vector.broadcast %cst_15 : f32 to vector<8x1xf32>
    %52 = arith.subf %51, %50 : vector<8x1xf32>
    %cst_16 = arith.constant 0.000000e+00 : f32
    %53 = vector.broadcast %cst_16 : f32 to vector<8x1xf32>
    %54 = arith.select %6, %52, %53 : vector<8x1xi1>, vector<8x1xf32>
    %55 = vector.shape_cast %54 : vector<8x1xf32> to vector<1x8x1xf32>
    %cst_17 = arith.constant dense<0.000000e+00> : vector<1xf32>
    %56 = vector.multi_reduction <add>, %55, %cst_17 [1, 2] : vector<1x8x1xf32> to vector<1xf32>
    %57 = vector.shape_cast %56 : vector<1xf32> to vector<1x1x1xf32>
    %58 = vector.extract %57[0, 0, 0] : f32 from vector<1x1x1xf32>
    %59 = arith.subf %19, %33 : vector<8x1xf32>
    %60 = arith.subf %10, %24 : vector<8x128xf32>
    %61 = vector.broadcast %59 : vector<8x1xf32> to vector<8x128xf32>
    %62 = arith.subf %60, %61 : vector<8x128xf32>
    %63 = math.absf %62 : vector<8x128xf32>
    %cst_18 = arith.constant dense<0.000000e+00> : vector<8xf32>
    %64 = vector.multi_reduction <add>, %63, %cst_18 [1] : vector<8x128xf32> to vector<8xf32>
    %65 = vector.shape_cast %64 : vector<8xf32> to vector<8x1xf32>
    %cst_19 = arith.constant 0.000000e+00 : f32
    %66 = vector.broadcast %cst_19 : f32 to vector<8x1xf32>
    %67 = arith.select %6, %65, %66 : vector<8x1xi1>, vector<8x1xf32>
    %68 = vector.shape_cast %67 : vector<8x1xf32> to vector<1x8x1xf32>
    %cst_20 = arith.constant dense<0.000000e+00> : vector<1xf32>
    %69 = vector.multi_reduction <add>, %68, %cst_20 [1, 2] : vector<1x8x1xf32> to vector<1xf32>
    %70 = vector.shape_cast %69 : vector<1xf32> to vector<1x1x1xf32>
    %71 = vector.extract %70[0, 0, 0] : f32 from vector<1x1x1xf32>
    %72 = tpu.iota {dimensions = array<i32: 2>} : vector<1x8x128xi32>
    %c0_i32_21 = arith.constant 0 : i32
    %73 = vector.broadcast %c0_i32_21 : i32 to vector<1x8x128xi32>
    %74 = arith.cmpi eq, %72, %73 : vector<1x8x128xi32>
    %c1_i32_22 = arith.constant 1 : i32
    %75 = vector.broadcast %c1_i32_22 : i32 to vector<1x8x128xi32>
    %76 = arith.cmpi eq, %72, %75 : vector<1x8x128xi32>
    %cst_23 = arith.constant 0.000000e+00 : f32
    %77 = vector.broadcast %71 : f32 to vector<1x8x128xf32>
    %78 = vector.broadcast %cst_23 : f32 to vector<1x8x128xf32>
    %79 = arith.select %76, %77, %78 : vector<1x8x128xi1>, vector<1x8x128xf32>
    %80 = vector.broadcast %58 : f32 to vector<1x8x128xf32>
    %81 = arith.select %74, %80, %79 : vector<1x8x128xi1>, vector<1x8x128xf32>
    %c0_24 = arith.constant 0 : index
    %c0_25 = arith.constant 0 : index
    %c0_26 = arith.constant 0 : index
    %82 = vector.load %arg4[%c0_24, %c0_25, %c0_26] : memref<1x8x128xf32, #tpu.memory_space<vmem>>, vector<1x8x128xf32>
    tpu.vector_store %arg4[%c0_24, %c0_25, %c0_26], %81 {strides = array<i32>} : memref<1x8x128xf32, #tpu.memory_space<vmem>>, vector<1x8x128xf32>,
    return
  }
  func.func @transform_0(%arg0: i32) -> (i32, i32) {
    %c0_i32 = arith.constant 0 : i32
    %c0_i32_0 = arith.constant 0 : i32
    return %arg0, %c0_i32 : i32, i32
  }
  func.func @transform_1(%arg0: i32) -> (i32, i32) {
    %c0_i32 = arith.constant 0 : i32
    %c0_i32_0 = arith.constant 0 : i32
    return %arg0, %c0_i32 : i32, i32
  }
  func.func @transform_2(%arg0: i32) -> (i32, i32) {
    %c0_i32 = arith.constant 0 : i32
    %c0_i32_0 = arith.constant 0 : i32
    return %arg0, %c0_i32 : i32, i32
  }
  func.func @transform_3(%arg0: i32) -> (i32, i32, i32) {
    %c0_i32 = arith.constant 0 : i32
    %c0_i32_0 = arith.constant 0 : i32
    %c0_i32_1 = arith.constant 0 : i32
    return %arg0, %c0_i32, %c0_i32_0 : i32, i32, i32
  }
}

</mosaic_0001>

<bundles_post_ra>
// kernel: tpu_custom_call.1
= control target key start
LH: loop header
LB: loop body
LE: loop exit
PB: predicated region body
PF: predicated region fallthrough
CT: control target
= control target key end

     0   :  { %8 = vsyncpa [#allocation3], 0  ;;  %s791_s0 = inlined_call_operand.vmem [shape: f32[16,128], index: 0, kind: input, shape index: {}]   ;;  %s792_s1 = inlined_call_operand.hbm [shape: f32[16,128], index: 1, kind: input, shape index: {}]   ;;  %s793_s2 = inlined_call_operand.vmem [shape: s32[16,1], index: 2, kind: input, shape index: {}]   ;;  %s794_s3 = inlined_call_operand.hbm [shape: f32[2,8,128], index: 3, kind: output, shape index: {}]  }
   0x1   :  { %10 = vsyncpa [#allocation3 + $0x1], 0 }
   0x2   :  { %11 = vsyncpa [#allocation4], 0 }
   0x3   :  { %13 = vsyncpa [#allocation4 + $0x1], 0  ;;  %s612_s12 = smov 0   ;;  %s614_s13 = smov 0  }
   0x4   :  { %s616_s14 = smov 0   ;;  %s618_s15 = smov 0  }
   0x5 LB: > { %s633_s16 = sadd.s32 4294967295, %s586_s15   ;;  %s414_s17 = sadd.s32 4294967294, %s586_s15   ;;  %s586_s15 = sphi %s618_s15, %s809_s15   ;;  %s582_s14 = sphi %s616_s14, %s808_s14   ;;  %s578_s13 = sphi %s614_s13, %s807_s13   ;;  %s574_s12 = sphi %s612_s12, %s806_s12  }
   0x6   : > { %s637_s18 = sadd.s32 1, %s586_s15   ;;  %s52_s19 = sadd.s32 1, %s582_s14 }
   0x7   : > { %s49_s20 = ssub.s32 %s586_s15, %s637_s18  ;;  %p59_p0 = scmp.ne.s32.totalorder %s582_s14, %s578_s13 }
   0x8   : > { %p50_p1 = scmp.eq.s32.totalorder %s49_s20, 0  ;;  %p60_p2 = scmp.eq.s32.totalorder %s586_s15, 0 }
   0x9   : > { %p65_p3 = scmp.ne.s32.totalorder %s578_s13, %s574_s12  ;;  %p66_p4 = scmp.eq.s32.totalorder %s633_s16, 0 }
   0xa   : > { %s649_s21 = scalar_select %p50_p1, %s582_s14, %s52_s19  }
   0xb   : > { %p651_p5 = por %p60_p2, %p59_p0  ;;  %p655_p6 = por %p66_p4, %p65_p3 }
   0xc   : > { %p115_p7 = scmp.eq.s32.totalorder %s633_s16, 1  ;;  %p121_p8 = scmp.eq.s32.totalorder %s414_s17, 1 }
   0xd   : > { %p445_p10 = scmp.lt.s32.totalorder %s586_s15, 2  ;;  %s148_s26 = sand.u32 1, %s582_s14  }
   0xe   : > { %p662_p11 = por %p115_p7, %p59_p0  ;;  %p666_p12 = por %p121_p8, %p65_p3 }
   0xf   : > { %s418_s27 = sshll.u32 %s586_s15, 7  ;;  %s417_s28 = sshll.u32 %s148_s26, 3 }
  0x10   : > { %s798_s24 = scalar_select %p662_p11, 1, 0 }
  0x11   : > { %s799_s25 = scalar_select %p666_p12, 1, 0 }
  0x12   : > { %s675_s4 = scalar_lea.hbm %s792_s1, %s418_s27  ;;  %s152_s5 = scalar_lea.vmem [#allocation2], %s417_s28 }
  0x13   : > { %s159_s6 = sshll.u32 %s152_s5, 4  ;;  %p679_p13 = pnand %p445_p10, %p651_p5  ;;  %s683_s6 = int_to_ptr.vmem [resolvable:$true] %s159_s6 }
  0x14   : > { %s149_s8 = scalar_lea.sflag [#allocation3], %s148_s26  ;;  %s490_s9 = scalar_lea.hbm %s675_s4, 128 }
  0x15   : > { %p491_p2 = scmp.ne.s32.totalorder %s675_s4, %s490_s9  ;;  %p492_p3 = pneg %p679_p13 }
  0x16   : > { %s495_s17 = scalar_lea.hbm %s792_s1, 256  ;;  %p496_p5 = scmp.lt.u32.totalorder %s675_s4, %s792_s1 }
  0x17   : > { %p493_p4 = pnand %p492_p3, %p491_p2  ;;  %p497_p8 = scmp.lt.u32.totalorder %s495_s17, %s490_s9 }
  0x18   : > { %p499_p9 = scmp.lt.u32.totalorder %s490_s9, %s675_s4 }
  0x19   : > { %p494_p7 = pneg %p493_p4  ;;  %p498_p10 = por %p497_p8, %p496_p5 }
  0x1b   : > { %p500_p0 = por %p499_p9, %p498_p10 }
  0x1d   : > { %p501_p1 = pnand %p500_p0, %p494_p7 }
  0x1f   : > { %504 = shalt.err (!%p501_p1)
}
  0x20   : > { %s505_s22 = scalar_lea.vmem %s683_s6, 128  ;;  %s588_s26 = smov [#allocation2]  }
  0x21   : > { %p506_p2 = scmp.ne.s32.totalorder %s683_s6, %s505_s22  ;;  %s510_s27 = sshll.u32 %s588_s26, 4  ;;  %s511_s27 = int_to_ptr.vmem [resolvable:$false] %s510_s27 }
  0x22   : > { %s512_s28 = scalar_lea.vmem %s511_s27, 256  ;;  %p513_p11 = scmp.lt.s32.totalorder %s683_s6, %s511_s27 }
  0x23   : > { %p508_p4 = pnand %p506_p2, %p492_p3  ;;  %p514_p5 = scmp.lt.s32.totalorder %s512_s28, %s505_s22 }
  0x25   : > { %p509_p12 = pneg %p508_p4  ;;  %p515_p8 = por %p514_p5, %p513_p11 }
  0x27   : > { %p516_p9 = pnand %p515_p8, %p509_p12 }
  0x29   : > { %519 = shalt.err (!%p516_p9)
}
  0x2a   : > { %440 = dma.hbm_to_vmem [thread:$0]  (!%p679_p13), %s675_s4, 128, %s683_s6, %s149_s8  }
  0x2b   : > { %p801_p0 = scmp.lt.s32.totalorder %s586_s15, 3  ;;  %p802_p1 = scmp.ge.s32.totalorder %s586_s15, 1 }
  0x2d   : > { %p172_p3 = pnand %p802_p1, %p801_p0 }
  0x2e   : > { %s717_s29 = sand.u32 (!%p172_p3), 1, %s578_s13  }
  0x2f   : > { %175 = sbr.rel (%p172_p3) target bundleno = 751 (0x2ef), region = 32  ;;  %s420_s30 = sshll.u32 (!%p172_p3), %s717_s29, 3 }
  0x30   : > { %s178_s5 = scalar_lea.sflag (!%p172_p3), [#allocation3], %s717_s29  ;;  %s181_s7 = scalar_lea.vmem (!%p172_p3), [#allocation2], %s420_s30 }
  0x36   : > { %565 = dma.done.wait (%p655_p6), %s178_s5, 128  }
  0x37   : > { %567 = vsyncadd (%p655_p6), %s178_s5, 4294967168  ;;  %p212_p11 = scmp.lt.s32.totalorder %s633_s16, 1  ;;  %v589_v0 = vmov 0   ;;  %v247_v2 = vld [vmem:[%s181_s7] sm:$0xff]  ;;  %v222_v10 = vlaneseq  ;;  %s424_s19 = sshll.u32 %s633_s16, 3  ;;  %v590_v25 = vmov 1.0  }
  0x38   : > { %481 = vset.pattern.permute.xlu0 %v589_v0  ;;  %v224_v32 = vstv %s424_s19  ;;  %vm271_vm4 = vcmask 7168   ;;  %s426_s22 = sshll.u32 %s633_s16, 7  ;;  %s211_s26 = scalar_lea.vmem [#allocation5], %s420_s30 }
  0x39   : > { %s213_s4 = scalar_select %p212_p11, %s633_s16, 1  ;;  %v735_v11 = vand.u32 127, %v222_v10  ;;  %v223_v28 = vshrl.u32 %v222_v10, 7 }
  0x3a   : > { %s320_s27 = sshll.u32 %s211_s26, 4  ;;  %s307_s16 = scalar_lea.sflag [#allocation4], %s717_s29  ;;  %s749_s27 = int_to_ptr.vmem [resolvable:$true] %s320_s27 }
  0x3b   : > { %s422_s6 = sshll.u32 %s213_s4, 3  ;;  %v225_v35 = vadd.s32 %v224_v32, %v223_v28  ;;  %vm300_vm5 = vcmp.eq.s32.totalorder %v735_v11, 1  ;;  %vm299_vm6 = vcmp.eq.s32.totalorder %v735_v11, 0  ;;  %s747_s4 = scalar_lea.hbm %s794_s3, %s426_s22 }
  0x3c   : > { %s215_s10 = scalar_lea.vmem %s791_s0, %s422_s6  ;;  %s219_s23 = scalar_lea.vmem %s793_s2, %s422_s6 }
  0x3d   : > { %v233_v1 = vld [vmem:[%s215_s10] sm:$0xff]  ;;  %vm226_vm3 = vcmp.lt.s32.totalorder %v225_v35, 16  ;;  %s520_s30 = scalar_lea.vmem %s749_s27, 128  ;;  %p803_p12 = scmp.ne.s32.totalorder %s798_s24, 0 }
  0x3e   : > { %234 = vmax.xlane.f32.xlu0 %v233_v1  ;;  %v220_v3 = vld [vmem:[%s219_s23] sm:$0xff]  ;;  %v283_v27 = vsub.f32 %v233_v1, %v247_v2  ;;  %p521_p6 = scmp.ne.s32.totalorder %s749_s27, %s520_s30  ;;  %s591_s6 = smov [#allocation5]  }
  0x3f   : > { %vm261_vm1 = vcmp.eq.s32.totalorder %v220_v3, 1  ;;  %vm263_vm2 = vcmp.eq.s32.totalorder %v220_v3, 0  ;;  %s524_s8 = sshll.u32 %s591_s6, 4  ;;  %s525_s8 = int_to_ptr.vmem [resolvable:$false] %s524_s8 }
  0x40   : > { %v262_v26 = vsel %vm261_vm1, 2.0, %v590_v25  ;;  %p522_p13 = pnand %p521_p6, %p803_p12  ;;  %s526_s9 = scalar_lea.vmem %s525_s8, 256 }
  0x41   : > { %v264_v36 = vsel %vm263_vm2, 0.0, %v262_v26  ;;  %p527_p10 = scmp.lt.s32.totalorder %s749_s27, %s525_s8  ;;  %p528_p2 = scmp.lt.s32.totalorder %s526_s9, %s520_s30 }
  0x42   : > { %248 = vmax.xlane.f32.xlu0 %v247_v2  ;;  %p523_p7 = pneg %p522_p13 }
  0x43   : > { %p529_p4 = por %p528_p2, %p527_p10 }
  0x45   : > { %p530_p5 = pnand %p529_p4, %p523_p7 }
  0x58   : > { %230 = vperm.xlu0 %481, %v220_v3  }
  0xcb   : > { %v235_v4 = vpop.xlane.xlu0 %234 }
  0xcc   : > { %v236_v5 = vsub.f32 %v233_v1, %v235_v4 }
  0xce   : > { %v237_v6 = vmul.f32 1.442695, %v236_v5 }
  0xcf   : > { %v249_v7 = vpop.xlane.xlu0 %248 }
  0xd0   : > { %v250_v8 = vsub.f32 %v247_v2, %v249_v7  ;;  %482 = vpow2.f32 %v237_v6 }
  0xd2   : > { %v251_v9 = vmul.f32 1.442695, %v250_v8 }
  0xd4   : > { %484 = vpow2.f32 %v251_v9 }
  0xd7   : > { %v231_v13 = vpop.permute.xlu0 %230 }
  0xd8   : > { %vm232_vm0 = vcmp.eq.s32.totalorder %v735_v11, %v231_v13 }
  0xd9   : > { %v244_v15 = vsel %vm232_vm0, %v233_v1, 0.0  ;;  %v258_v16 = vsel %vm232_vm0, %v247_v2, 0.0 }
  0xda   : > { %v483_v12 = vpop.eup %482 }
  0xdb   : > { %239 = vadd.xlane.f32.xlu1 %v483_v12 }
  0xde   : > { %v485_v14 = vpop.eup %484 }
  0xdf   : > { %253 = vadd.xlane.f32.xlu1 %v485_v14 }
  0xe3   : > { %245 = vadd.xlane.f32.xlu1 %v244_v15 }
  0xe7   : > { %259 = vadd.xlane.f32.xlu1 %v258_v16 }
 0x168   : > { %v240_v17 = vpop.xlane.xlu1 %239 }
 0x169   : > { %486 = vlog2.f32 %v240_v17 }
 0x16c   : > { %v254_v18 = vpop.xlane.xlu1 %253 }
 0x16d   : > { %488 = vlog2.f32 %v254_v18 }
 0x170   : > { %v246_v19 = vpop.xlane.xlu1 %245 }
 0x173   : > { %v487_v20 = vpop.eup %486 }
 0x174   : > { %v242_v21 = vmul.f32 0.6931472, %v487_v20  ;;  %v260_v23 = vpop.xlane.xlu1 %259 }
 0x175   : > { %v265_v31 = vadd.f32 %v260_v23, %v246_v19 }
 0x176   : > { %v243_v29 = vadd.f32 %v242_v21, %v235_v4 }
 0x177   : > { %v489_v22 = vpop.eup %488 }
 0x178   : > { %v256_v24 = vmul.f32 0.6931472, %v489_v22 }
 0x17a   : > { %v257_v30 = vadd.f32 %v256_v24, %v249_v7 }
 0x17c   : > { %v266_v33 = vadd.f32 %v257_v30, %v243_v29  ;;  %v282_v34 = vsub.f32 %v243_v29, %v257_v30 }
 0x17e   : > { %v267_v37 = vsub.f32 %v265_v31, %v266_v33  ;;  %v284_v38 = vsub.f32 %v283_v27, %v282_v34 }
 0x180   : > { %v285_v39 = vand.u32 2147483647, %v284_v38  ;;  %v268_v40 = vmul.f32 %v267_v37, %v264_v36 }
 0x182   : > { %286 = vadd.xlane.f32.xlu1 %v285_v39  ;;  %v269_v41 = vsub.f32 0.0, %v268_v40 }
 0x184   : > { %v270_v42 = vsel %vm226_vm3, %v269_v41, 0.0 }
 0x185   : > { %v272_v43 = vsel %vm271_vm4, %v270_v42, 0.0 }
 0x186   : > { %273 = vadd.xlane.f32.xlu1 %v272_v43 }
 0x20f   : > { %v287_v44 = vpop.xlane.xlu1 %286 }
 0x210   : > { %v288_v45 = vsel %vm226_vm3, %v287_v44, 0.0 }
 0x211   : > { %v289_v46 = vsel %vm271_vm4, %v288_v45, 0.0 }
 0x212   : > { %290 = vadd.xlane.f32.xlu1 %v289_v46 }
 0x213   : > { %v274_v47 = vpop.xlane.xlu1 %273 }
 0x214   : > { %v275_v48 = vrot.slane %v274_v47, 4 }
 0x216   : > { %v276_v49 = vadd.f32 %v275_v48, %v274_v47 }
 0x218   : > { %v277_v50 = vrot.slane %v276_v49, 2 }
 0x21a   : > { %v278_v51 = vadd.f32 %v277_v50, %v276_v49 }
 0x21c   : > { %v279_v52 = vrot.slane %v278_v51, 1 }
 0x21e   : > { %v280_v53 = vadd.f32 %v279_v52, %v278_v51 }
 0x220   : > { %429 = vpush %v280_v53 }
 0x251   : > { %s430_s20 = spop %429 }
 0x252   : > { %v303_v62 = vstv %s430_s20 }
 0x29f   : > { %v291_v54 = vpop.xlane.xlu1 %290 }
 0x2a0   : > { %v292_v55 = vrot.slane %v291_v54, 4 }
 0x2a2   : > { %v293_v56 = vadd.f32 %v292_v55, %v291_v54 }
 0x2a4   : > { %v294_v57 = vrot.slane %v293_v56, 2 }
 0x2a6   : > { %v295_v58 = vadd.f32 %v294_v57, %v293_v56 }
 0x2a8   : > { %v296_v59 = vrot.slane %v295_v58, 1 }
 0x2aa   : > { %v297_v60 = vadd.f32 %v296_v59, %v295_v58 }
 0x2ac   : > { %431 = vpush %v297_v60 }
 0x2dd   : > { %s432_s28 = spop %431 }
 0x2de   : > { %v301_v61 = vstv %s432_s28 }
 0x2df   : > { %v302_v63 = vsel %vm300_vm5, %v301_v61, 0.0 }
 0x2e0   : > { %v304_v0 = vsel %vm299_vm6, %v303_v62, %v302_v63 }
 0x2e1   : > { %305 = vst [vmem:[%s211_s26] sm:$0xff] %v304_v0 }
 0x2e2   : > { %533 = shalt.err (!%p530_p5)
}
 0x2e3   : > { %s534_s29 = scalar_lea.hbm %s747_s4, 128  ;;  %s538_s17 = scalar_lea.hbm %s794_s3, 256 }
 0x2e4   : > { %p535_p8 = scmp.ne.s32.totalorder %s747_s4, %s534_s29  ;;  %p539_p1 = scmp.lt.u32.totalorder %s747_s4, %s794_s3 }
 0x2e5   : > { %p540_p3 = scmp.lt.u32.totalorder %s538_s17, %s534_s29  ;;  %p542_p6 = scmp.lt.u32.totalorder %s534_s29, %s747_s4 }
 0x2e6   : > { %p536_p9 = pnand %p535_p8, %p803_p12 }
 0x2e7   : > { %p541_p11 = por %p540_p3, %p539_p1 }
 0x2e8   : > { %p537_p0 = pneg %p536_p9 }
 0x2e9   : > { %p543_p13 = por %p542_p6, %p541_p11 }
 0x2eb   : > { %p544_p7 = pnand %p543_p13, %p537_p0 }
 0x2ed   : > { %547 = shalt.err (!%p544_p7)
}
 0x2ee   : > { %435 = dma.vmem_to_hbm [thread:$0]  (%p803_p12), %s749_s27, 128, %s747_s4, %s307_s16  }
 0x2ef PF: > { %s332_s20 = sand.u32 1, %s574_s12   ;;  %p804_p10 = scmp.ne.s32.totalorder %s799_s25, 0 }
 0x2f0   : > { %p805_p2 = scmp.ge.s32.totalorder %s586_s15, 2  ;;  %s333_s22 = scalar_lea.sflag [#allocation4], %s332_s20 }
 0x2f2   : > { %p442_p4 = pnand %p805_p2, %p804_p10 }
 0x2f4   : > { %569 = dma.done.wait (!%p442_p4), %s333_s22, 128  }
 0x2f5   : > { %571 = vsyncadd (!%p442_p4), %s333_s22, 4294967168  ;;  %p16_p5 = scmp.ge.s32.totalorder %s637_s18, 4   ;;  %s806_s12 = smov %s578_s13 }
 0x2f6   : > { %s807_s13 = smov %s582_s14  ;;  %s808_s14 = smov %s649_s21 }
 0x2f7   : > { %s809_s15 = smov %s637_s18  ;;  %18 = sbr.rel (!%p16_p5) target bundleno = 5 (0x5), region = 83 }
 0x2fe   :  { %338 = vsyncpa [#allocation3], 1 }
 0x2ff   :  { %340 = vsyncpa [#allocation3 + $0x1], 1 }
 0x300   :  { %341 = vsyncpa [#allocation4], 1 }
 0x301   :  { %343 = vsyncpa [#allocation4 + $0x1], 1 }

</bundles_post_ra>
